<compile_context>
chip_gen: v6e
topology: v6e:2x2x1
jax: 0.10.0
libtpu: 0.0.40
codegen_flags: <defaults>
</compile_context>

<pallas_src>
import functools

import jax
import jax.numpy as jnp
from jax import lax
from jax.experimental import pallas as pl
from jax.experimental.pallas import tpu as pltpu

LAYER_NORM_EPS = 1e-12

# Conservative VMEM budget that leaves headroom on every generation
# (v5e/v6e: 128 MiB physical, v7x: 64 MiB per TensorCore + internal scratch).
_VMEM_BUDGET = 40 * 1024 * 1024


def _round_up(x, m):
    return -(-x // m) * m


# ---------------------------------------------------------------------------
# Kernels
# ---------------------------------------------------------------------------
def self_output_resident_kernel(x_ref, res_ref, w_ref, b_ref, g_ref, beta_ref, o_ref):
    # x_ref:   (TM, H)  hidden_states row tile (native dtype)
    # res_ref: (TM, H)  residual row tile
    # w_ref:   (H, H)   full weight, VMEM-resident (index_map constant)
    # b_ref/g_ref/beta_ref: (1, H)
    # o_ref:   (TM, H)
    y = jnp.dot(x_ref[...], w_ref[...], preferred_element_type=jnp.float32)
    # TODO(synk): dropout is identity (inference / eval semantics).
    y = y + b_ref[...].astype(jnp.float32) + res_ref[...].astype(jnp.float32)

    # Two-pass LayerNorm (numerically safer than E[y^2]-mean^2 after residual add).
    mean = jnp.mean(y, axis=-1, keepdims=True)
    yc = y - mean
    var = jnp.mean(yc * yc, axis=-1, keepdims=True)
    norm = yc * lax.rsqrt(var + LAYER_NORM_EPS)
    out = (norm * g_ref[...].astype(jnp.float32)
           + beta_ref[...].astype(jnp.float32))
    o_ref[...] = out.astype(o_ref.dtype)


def self_output_streamed_kernel(x_ref, res_ref, w_ref, b_ref, g_ref, beta_ref,
                                o_ref, acc_ref):
    # x_ref:   (TM, TK)  hidden_states tile
    # res_ref: (TM, H)   residual tile (constant across K -> no re-DMA)
    # w_ref:   (TK, H)   streamed weight K-tile
    # acc_ref: (TM, H)   f32 accumulator scratch
    k = pl.program_id(1)

    @pl.when(k == 0)
    def _():
        # Fold bias + residual into the accumulator init (off the epilogue path).
        acc_ref[...] = (res_ref[...].astype(jnp.float32)
                        + b_ref[...].astype(jnp.float32))

    acc_ref[...] += jnp.dot(x_ref[...], w_ref[...],
                            preferred_element_type=jnp.float32)

    @pl.when(k == pl.num_programs(1) - 1)
    def _():
        # TODO(synk): dropout is identity (inference / eval semantics).
        y = acc_ref[...]
        mean = jnp.mean(y, axis=-1, keepdims=True)
        yc = y - mean
        var = jnp.mean(yc * yc, axis=-1, keepdims=True)
        norm = yc * lax.rsqrt(var + LAYER_NORM_EPS)
        out = (norm * g_ref[...].astype(jnp.float32)
               + beta_ref[...].astype(jnp.float32))
        o_ref[...] = out.astype(o_ref.dtype)


# ---------------------------------------------------------------------------
# VMEM footprint models (conservative: everything counted double-buffered)
# ---------------------------------------------------------------------------
def _resident_footprint(H, tm, a_item, w_item):
    w = 2 * H * H * w_item                 # resident weight (count 2 bufs, safe)
    act = 3 * 2 * tm * H * a_item          # x, res, out
    par = 3 * 2 * H * w_item               # bias / gamma / beta
    tmp = 4 * tm * H * 4                   # f32 epilogue temporaries
    return w + act + par + tmp


def _streamed_footprint(H, tm, tk, a_item, w_item):
    x = 2 * tm * tk * a_item
    w = 2 * tk * H * w_item
    act = 2 * 2 * tm * H * a_item          # res, out
    par = 3 * 2 * H * w_item
    acc = tm * H * 4
    tmp = 4 * tm * H * 4
    return x + w + act + par + acc + tmp


# ---------------------------------------------------------------------------
# Wrapper
# ---------------------------------------------------------------------------
@functools.partial(jax.jit, static_argnames=("tm",))
def self_output(hidden_states, input_tensor, weight_t, bias, gamma, beta, *, tm=None):
    """hidden_states, input_tensor: [B, S, H].
    weight_t: [H_in, H_out] -- PyTorch nn.Linear weight pre-transposed ONCE
    outside the hot path (weight_t = weight.T), so no per-call H^2 transpose.
    """
    B, S, H = hidden_states.shape
    N = B * S
    dtype = hidden_states.dtype
    a_item = jnp.dtype(dtype).itemsize
    w_item = jnp.dtype(weight_t.dtype).itemsize

    x2 = hidden_states.reshape(N, H)
    r2 = input_tensor.reshape(N, H)
    b2 = bias.reshape(1, H)
    g2 = gamma.reshape(1, H)
    beta2 = beta.reshape(1, H)

    n_sub = _round_up(N, 8)

    def pick_tm(desired):
        if N <= 8:
            return N                                   # block == full array dim
        t = min(desired, n_sub)
        # Guarantee >= 2 row tiles so the "parallel" rows axis can shard across
        # the two TensorCores on v7x (no-op on single-TC v5e/v6e).
        if t >= N and n_sub >= 16:
            t = _round_up(-(-n_sub // 2), 8)
        return t

    # --- choose resident vs streamed path (static decision) -----------------
    use_resident = False
    tm_eff = pick_tm(256 if tm is None else tm)
    if 2 * H * H * w_item <= int(_VMEM_BUDGET * 0.6):
        t = tm_eff
        while t > 8 and _resident_footprint(H, t, a_item, w_item) > _VMEM_BUDGET:
            t = max(8, _round_up(t // 2, 8))
        if _resident_footprint(H, t, a_item, w_item) <= _VMEM_BUDGET:
            use_resident = True
            tm_eff = t

    if use_resident:
        n_rows = pl.cdiv(N, tm_eff)
        footprint = _resident_footprint(H, tm_eff, a_item, w_item)
        vmem_limit = int(min(max(footprint + (8 << 20), 32 << 20), 56 << 20))
        cost = pl.CostEstimate(
            flops=2 * N * H * H,
            transcendentals=N,                                   # rsqrt per row
            bytes_accessed=3 * N * H * a_item + (H * H + 3 * H) * w_item,
        )
        out = pl.pallas_call(
            self_output_resident_kernel,
            out_shape=jax.ShapeDtypeStruct((N, H), dtype),
            grid_spec=pltpu.PrefetchScalarGridSpec(
                num_scalar_prefetch=0,
                grid=(n_rows,),
                in_specs=[
                    pl.BlockSpec((tm_eff, H), lambda i: (i, 0)),   # x rows
                    pl.BlockSpec((tm_eff, H), lambda i: (i, 0)),   # residual rows
                    pl.BlockSpec((H, H), lambda i: (0, 0)),        # resident weight
                    pl.BlockSpec((1, H), lambda i: (0, 0)),        # bias
                    pl.BlockSpec((1, H), lambda i: (0, 0)),        # gamma
                    pl.BlockSpec((1, H), lambda i: (0, 0)),        # beta
                ],
                out_specs=pl.BlockSpec((tm_eff, H), lambda i: (i, 0)),
            ),
            compiler_params=pltpu.CompilerParams(
                dimension_semantics=("parallel",),
                vmem_limit_bytes=vmem_limit),
            cost_estimate=cost,
        )(x2, r2, weight_t, b2, g2, beta2)
        return out.reshape(B, S, H)

    # --- streamed (K-tiled) fallback for large weights -----------------------
    tm_eff = pick_tm(512 if tm is None else tm)        # tm is the primary knob
    tk_cands = [c for c in (512, 384, 256, 128, 64) if H % c == 0] or [H]
    tk = None
    t = tm_eff
    while tk is None:
        for c in tk_cands:
            if _streamed_footprint(H, t, c, a_item, w_item) <= _VMEM_BUDGET:
                tk = c
                break
        if tk is None:
            if t <= 8:
                tk = tk_cands[-1]                      # give up shrinking; smallest tk
                break
            t = max(8, _round_up(t // 2, 8))
    tm_eff = t

    n_rows = pl.cdiv(N, tm_eff)
    n_k = H // tk
    footprint = _streamed_footprint(H, tm_eff, tk, a_item, w_item)
    vmem_limit = int(min(max(footprint + (8 << 20), 32 << 20), 56 << 20))
    cost = pl.CostEstimate(
        flops=2 * N * H * H,
        transcendentals=N,
        # weight is re-streamed once per row tile in this scheme
        bytes_accessed=3 * N * H * a_item + (n_rows * H * H + 3 * H) * w_item,
    )
    out = pl.pallas_call(
        self_output_streamed_kernel,
        out_shape=jax.ShapeDtypeStruct((N, H), dtype),
        grid_spec=pltpu.PrefetchScalarGridSpec(
            num_scalar_prefetch=0,
            grid=(n_rows, n_k),                                   # reduction axis last
            in_specs=[
                pl.BlockSpec((tm_eff, tk), lambda i, k: (i, k)),  # x rows / K tile
                pl.BlockSpec((tm_eff, H), lambda i, k: (i, 0)),   # residual rows
                pl.BlockSpec((tk, H), lambda i, k: (k, 0)),       # streamed weight tile
                pl.BlockSpec((1, H), lambda i, k: (0, 0)),        # bias
                pl.BlockSpec((1, H), lambda i, k: (0, 0)),        # gamma
                pl.BlockSpec((1, H), lambda i, k: (0, 0)),        # beta
            ],
            out_specs=pl.BlockSpec((tm_eff, H), lambda i, k: (i, 0)),
            scratch_shapes=[pltpu.VMEM((tm_eff, H), jnp.float32)],
        ),
        compiler_params=pltpu.CompilerParams(
            dimension_semantics=("parallel", "arbitrary"),
            vmem_limit_bytes=vmem_limit),
        cost_estimate=cost,
    )(x2, r2, weight_t, b2, g2, beta2)
    return out.reshape(B, S, H)


# ---------------------------------------------------------------------------
# Pure-JAX reference
# ---------------------------------------------------------------------------
def self_output_ref(hidden_states, input_tensor, weight, bias, gamma, beta):
    h = jnp.einsum("bsh,oh->bso", hidden_states, weight) + bias
    y = h + input_tensor
    mean = jnp.mean(y, axis=-1, keepdims=True)
    var = jnp.mean((y - mean) ** 2, axis=-1, keepdims=True)
    return (y - mean) / jnp.sqrt(var + LAYER_NORM_EPS) * gamma + beta


if __name__ == "__main__":
    key = jax.random.PRNGKey(0)
    B, S, H = 2, 8, 32
    k1, k2, k3, k4 = jax.random.split(key, 4)

    hidden_states = jax.random.normal(k1, (B, S, H), dtype=jnp.float32)
    input_tensor = jax.random.normal(k2, (B, S, H), dtype=jnp.float32)

    # PyTorch Linear-style init; weight stored [out, in].
    bound = 1.0 / (H ** 0.5)
    weight = jax.random.uniform(k3, (H, H), jnp.float32, -bound, bound)
    bias = jax.random.uniform(k4, (H,), jnp.float32, -bound, bound)
    gamma = jnp.ones((H,), jnp.float32)
    beta = jnp.zeros((H,), jnp.float32)

    # Pre-transpose once (outside the hot path / jit) and reuse.
    weight_t = jnp.asarray(weight.T)

    out = self_output(hidden_states, input_tensor, weight_t, bias, gamma, beta)
    out = jax.block_until_ready(out)

    ref = self_output_ref(hidden_states, input_tensor, weight, bias, gamma, beta)
    assert out.shape == (B, S, H)
    assert jnp.allclose(out, ref, atol=1e-4, rtol=1e-4), "mismatch vs reference"
    print("KERNEL_OK")
</pallas_src>

<mosaic_0001>
module attributes {stable_mosaic.version = 11 : i64} {
  func.func @self_output_resident_kernel(%arg0: i32, %arg1: memref<8x32xf32, #tpu.memory_space<vmem>>, %arg2: memref<8x32xf32, #tpu.memory_space<vmem>>, %arg3: memref<32x32xf32, #tpu.memory_space<vmem>>, %arg4: memref<1x32xf32, #tpu.memory_space<vmem>>, %arg5: memref<1x32xf32, #tpu.memory_space<vmem>>, %arg6: memref<1x32xf32, #tpu.memory_space<vmem>>, %arg7: memref<8x32xf32, #tpu.memory_space<vmem>>) attributes {dimension_semantics = [#tpu.dimension_semantics<parallel>], iteration_bounds = array<i64: 2>, scalar_prefetch = 0 : i64, scratch_operands = 0 : i64, tpu.core_type = #tpu.core_type<tc>, window_params = [{transform_indices = @transform_0, window_bounds = array<i64: 8, 32>}, {transform_indices = @transform_1, window_bounds = array<i64: 8, 32>}, {pipeline_mode = #tpu.pipeline_mode<synchronous>, transform_indices = @transform_2, window_bounds = array<i64: 32, 32>}, {pipeline_mode = #tpu.pipeline_mode<synchronous>, transform_indices = @transform_3, window_bounds = array<i64: 1, 32>}, {pipeline_mode = #tpu.pipeline_mode<synchronous>, transform_indices = @transform_4, window_bounds = array<i64: 1, 32>}, {pipeline_mode = #tpu.pipeline_mode<synchronous>, transform_indices = @transform_5, window_bounds = array<i64: 1, 32>}, {transform_indices = @transform_6, window_bounds = array<i64: 8, 32>}]} {
    %c0 = arith.constant 0 : index
    %c0_0 = arith.constant 0 : index
    %0 = vector.load %arg1[%c0, %c0_0] : memref<8x32xf32, #tpu.memory_space<vmem>>, vector<8x32xf32>
    %c0_1 = arith.constant 0 : index
    %c0_2 = arith.constant 0 : index
    %1 = vector.load %arg3[%c0_1, %c0_2] : memref<32x32xf32, #tpu.memory_space<vmem>>, vector<32x32xf32>
    %cst = arith.constant dense<0.000000e+00> : vector<8x32xf32>
    %2 = tpu.matmul %0, %1, %cst {dimension_numbers = #tpu.dot_dimension_numbers<[1], [0], [0], [1], [0, 0, 1, 1], [], []>} : vector<8x32xf32>, vector<32x32xf32>, vector<8x32xf32> -> vector<8x32xf32>
    %c0_3 = arith.constant 0 : index
    %c0_4 = arith.constant 0 : index
    %3 = vector.load %arg4[%c0_3, %c0_4] : memref<1x32xf32, #tpu.memory_space<vmem>>, vector<1x32xf32>
    %4 = vector.broadcast %3 : vector<1x32xf32> to vector<8x32xf32>
    %5 = arith.addf %2, %4 : vector<8x32xf32>
    %c0_5 = arith.constant 0 : index
    %c0_6 = arith.constant 0 : index
    %6 = vector.load %arg2[%c0_5, %c0_6] : memref<8x32xf32, #tpu.memory_space<vmem>>, vector<8x32xf32>
    %7 = arith.addf %5, %6 : vector<8x32xf32>
    %cst_7 = arith.constant dense<0.000000e+00> : vector<8xf32>
    %8 = vector.multi_reduction <add>, %7, %cst_7 [1] : vector<8x32xf32> to vector<8xf32>
    %9 = vector.shape_cast %8 : vector<8xf32> to vector<8x1xf32>
    %cst_8 = arith.constant 3.200000e+01 : f32
    %10 = vector.broadcast %cst_8 : f32 to vector<8x1xf32>
    %11 = arith.divf %9, %10 : vector<8x1xf32>
    %12 = vector.broadcast %11 : vector<8x1xf32> to vector<8x32xf32>
    %13 = arith.subf %7, %12 : vector<8x32xf32>
    %14 = arith.mulf %13, %13 : vector<8x32xf32>
    %cst_9 = arith.constant dense<0.000000e+00> : vector<8xf32>
    %15 = vector.multi_reduction <add>, %14, %cst_9 [1] : vector<8x32xf32> to vector<8xf32>
    %16 = vector.shape_cast %15 : vector<8xf32> to vector<8x1xf32>
    %cst_10 = arith.constant 3.200000e+01 : f32
    %17 = vector.broadcast %cst_10 : f32 to vector<8x1xf32>
    %18 = arith.divf %16, %17 : vector<8x1xf32>
    %cst_11 = arith.constant 9.99999996E-13 : f32
    %19 = vector.broadcast %cst_11 : f32 to vector<8x1xf32>
    %20 = arith.addf %18, %19 : vector<8x1xf32>
    %21 = math.rsqrt %20 : vector<8x1xf32>
    %22 = vector.broadcast %21 : vector<8x1xf32> to vector<8x32xf32>
    %23 = arith.mulf %13, %22 : vector<8x32xf32>
    %c0_12 = arith.constant 0 : index
    %c0_13 = arith.constant 0 : index
    %24 = vector.load %arg5[%c0_12, %c0_13] : memref<1x32xf32, #tpu.memory_space<vmem>>, vector<1x32xf32>
    %25 = vector.broadcast %24 : vector<1x32xf32> to vector<8x32xf32>
    %26 = arith.mulf %23, %25 : vector<8x32xf32>
    %c0_14 = arith.constant 0 : index
    %c0_15 = arith.constant 0 : index
    %27 = vector.load %arg6[%c0_14, %c0_15] : memref<1x32xf32, #tpu.memory_space<vmem>>, vector<1x32xf32>
    %28 = vector.broadcast %27 : vector<1x32xf32> to vector<8x32xf32>
    %29 = arith.addf %26, %28 : vector<8x32xf32>
    %c0_16 = arith.constant 0 : index
    %c0_17 = arith.constant 0 : index
    %30 = vector.load %arg7[%c0_16, %c0_17] : memref<8x32xf32, #tpu.memory_space<vmem>>, vector<8x32xf32>
    tpu.vector_store %arg7[%c0_16, %c0_17], %29 {strides = array<i32>} : memref<8x32xf32, #tpu.memory_space<vmem>>, vector<8x32xf32>,
    return
  }
  func.func @transform_0(%arg0: i32) -> (i32, i32) {
    %c0_i32 = arith.constant 0 : i32
    %c0_i32_0 = arith.constant 0 : i32
    return %arg0, %c0_i32 : i32, i32
  }
  func.func @transform_1(%arg0: i32) -> (i32, i32) {
    %c0_i32 = arith.constant 0 : i32
    %c0_i32_0 = arith.constant 0 : i32
    return %arg0, %c0_i32 : i32, i32
  }
  func.func @transform_2(%arg0: i32) -> (i32, i32) {
    %c0_i32 = arith.constant 0 : i32
    %c0_i32_0 = arith.constant 0 : i32
    %c0_i32_1 = arith.constant 0 : i32
    return %c0_i32, %c0_i32_0 : i32, i32
  }
  func.func @transform_3(%arg0: i32) -> (i32, i32) {
    %c0_i32 = arith.constant 0 : i32
    %c0_i32_0 = arith.constant 0 : i32
    %c0_i32_1 = arith.constant 0 : i32
    return %c0_i32, %c0_i32_0 : i32, i32
  }
  func.func @transform_4(%arg0: i32) -> (i32, i32) {
    %c0_i32 = arith.constant 0 : i32
    %c0_i32_0 = arith.constant 0 : i32
    %c0_i32_1 = arith.constant 0 : i32
    return %c0_i32, %c0_i32_0 : i32, i32
  }
  func.func @transform_5(%arg0: i32) -> (i32, i32) {
    %c0_i32 = arith.constant 0 : i32
    %c0_i32_0 = arith.constant 0 : i32
    %c0_i32_1 = arith.constant 0 : i32
    return %c0_i32, %c0_i32_0 : i32, i32
  }
  func.func @transform_6(%arg0: i32) -> (i32, i32) {
    %c0_i32 = arith.constant 0 : i32
    %c0_i32_0 = arith.constant 0 : i32
    return %arg0, %c0_i32 : i32, i32
  }
}

</mosaic_0001>

<bundles_post_ra>
// kernel: self_output.1
= control target key start
LH: loop header
LB: loop body
LE: loop exit
PB: predicated region body
PF: predicated region fallthrough
CT: control target
= control target key end

     0   :  { %s1068_s0 = inlined_call_operand.hbm [shape: f32[16,32], index: 0, kind: input, shape index: {}]   ;;  %s1069_s1 = inlined_call_operand.hbm [shape: f32[16,32], index: 1, kind: input, shape index: {}]   ;;  %s1070_s2 = inlined_call_operand.hbm [shape: f32[32,32], index: 2, kind: input, shape index: {}]   ;;  %s1071_s3 = inlined_call_operand.vmem [shape: f32[1,32], index: 3, kind: input, shape index: {}]   ;;  %s1072_s4 = inlined_call_operand.vmem [shape: f32[1,32], index: 4, kind: input, shape index: {}]   ;;  %s1073_s5 = inlined_call_operand.vmem [shape: f32[1,32], index: 5, kind: input, shape index: {}]   ;;  %s1074_s6 = inlined_call_operand.hbm [shape: f32[16,32], index: 6, kind: output, shape index: {}]  }
   0x1   :  { %1080 = sst [smem:[#allocation15_spill]] %s1070_s2 }
   0x2   :  { %11 = vsyncpa [#allocation3], 0 }
   0x3   :  { %13 = vsyncpa [#allocation3 + $0x1], 0 }
   0x4   :  { %14 = vsyncpa [#allocation6], 0 }
   0x5   :  { %16 = vsyncpa [#allocation6 + $0x1], 0 }
   0x6   :  { %17 = vsyncpa [#allocation4], 0 }
   0x7   :  { %19 = vsyncpa [#allocation4 + $0x1], 0  ;;  %s857_s21 = smov 0   ;;  %s859_s22 = smov 0  }
   0x8   :  { %s861_s23 = smov 0   ;;  %s863_s24 = smov 0  }
   0x9 LB: > { %1081 = sst [smem:[#allocation13_spill]] %s808_s23  ;;  %s878_s25 = sadd.s32 4294967295, %s812_s24   ;;  %s812_s24 = sphi %s863_s24, %s1102_s24   ;;  %s808_s23 = sphi %s861_s23, %s1099_s23   ;;  %s804_s22 = sphi %s859_s22, %s1101_s22   ;;  %s800_s21 = sphi %s857_s21, %s1100_s21  }
   0xa   : > { %s553_s26 = sadd.s32 4294967294, %s812_s24   ;;  %p45_p0 = scmp.ne.s32.totalorder %s804_s22, %s800_s21 }
   0xb   : > { %p1076_p1 = scmp.eq.s32.totalorder %s878_s25, 0  ;;  %p185_p3 = scmp.eq.s32.totalorder %s553_s26, 1 }
   0xc   : > { %p554_p5 = scmp.ge.s32.totalorder %s812_s24, 1  ;;  %p192_p7 = scmp.lt.s32.totalorder %s812_s24, 3 }
   0xd   : > { %p887_p4 = por %p1076_p1, %p45_p0  ;;  %p892_p6 = por %p185_p3, %p45_p0 }
   0xe   : > { %p897_p8 = pnand %p554_p5, %p192_p7  ;;  %s814_s30 = smov [#allocation7]  }
   0xf   : > { %s1082_s27 = scalar_select %p887_p4, 1, 0 }
  0x10   : > { %s1083_s28 = scalar_select %p892_p6, 1, 0 }
  0x11   : > { %s1084_s29 = scalar_select %p897_p8, 1, 0 }
  0x12   : > { %s204_s7 = sshll.u32 %s814_s30, 4  ;;  %p600_p9 = pneg %p897_p8  ;;  %s205_s7 = int_to_ptr.vmem [resolvable:$true] %s204_s7 }
  0x13   : > { %s911_s9 = sadd.s32 1, %s812_s24   ;;  %s32_s10 = sadd.s32 1, %s808_s23 }
  0x14   : > { %p906_p11 = pnand %p600_p9, %p1076_p1  ;;  %s29_s11 = ssub.s32 %s812_s24, %s911_s9 }
  0x15   : > { %s669_s12 = scalar_lea.vmem %s205_s7, 512  ;;  %p677_p5 = scmp.lt.s32.totalorder %s205_s7, %s205_s7 }
  0x16   : > { %p660_p12 = pneg %p906_p11  ;;  %p670_p13 = scmp.ne.s32.totalorder %s205_s7, %s669_s12 }
  0x17   : > { %p678_p7 = scmp.lt.s32.totalorder %s669_s12, %s669_s12 }
  0x18   : > { %p672_p0 = pnand %p670_p13, %p660_p12 }
  0x19   : > { %p679_p10 = por %p678_p7, %p677_p5 }
  0x1a   : > { %p673_p3 = pneg %p672_p0 }
  0x1c   : > { %p680_p2 = pnand %p679_p10, %p673_p3 }
  0x1e   : > { %683 = shalt.err (!%p680_p2)
}
  0x1f   : > { %s815_s13 = smov 128   ;;  %s816_s14 = smov 8  }
  0x20   : > { %s1086_s2 = sld [smem:[#allocation15_spill]]  ;;  %p30_p9 = scmp.eq.s32.totalorder %s29_s11, 0 }
  0x21   : > { %p39_p12 = scmp.ne.s32.totalorder %s808_s23, %s804_s22  ;;  %p40_p10 = scmp.eq.s32.totalorder %s812_s24, 0 }
  0x22   : > { %p616_p2 = scmp.lt.s32.totalorder %s812_s24, 2  ;;  %p1088_p0 = scmp.eq.s32.totalorder %s878_s25, 1 }
  0x23   : > { %s928_s17 = scalar_select %p30_p9, %s808_s23, %s32_s10  }
  0x24   : > { %p41_p13 = por %p40_p10, %p39_p12  ;;  %p932_p3 = por %p1088_p0, %p39_p12 }
  0x25   : > { %1087 = sst [smem:[#allocation14_spill]] %s928_s17  ;;  %s227_s19 = sand.u32 1, %s808_s23  }
  0x26   : > { %603 = dma.hbm_to_vmem [thread:$0]  (!%p906_p11), %s1086_s2, 512, %s205_s7, [#allocation6], %s815_s13, %s815_s13, %s816_s14  }
  0x27   : > { %s1089_s18 = scalar_select %p932_p3, 1, 0 }
  0x28   : > { %s558_s20 = sshll.u32 %s812_s24, 7  ;;  %s938_s26 = sshll.u32 %s227_s19, 3 }
  0x29   : > { %s943_s7 = scalar_lea.hbm %s1068_s0, %s558_s20  ;;  %s231_s10 = scalar_lea.vmem [#allocation2], %s938_s26 }
  0x2a   : > { %s238_s11 = sshll.u32 %s231_s10, 4  ;;  %p946_p11 = pnand %p616_p2, %p41_p13  ;;  %s239_s11 = int_to_ptr.vmem [resolvable:$true] %s238_s11 }
  0x2b   : > { %s953_s15 = scalar_lea.hbm %s1069_s1, %s558_s20  ;;  %s228_s16 = scalar_lea.sflag [#allocation3], %s227_s19 }
  0x2c   : > { %s684_s30 = scalar_lea.hbm %s943_s7, 128  ;;  %p686_p7 = pneg %p946_p11 }
  0x2d   : > { %p685_p5 = scmp.ne.s32.totalorder %s943_s7, %s684_s30  ;;  %s689_s2 = scalar_lea.hbm %s1068_s0, 256 }
  0x2e   : > { %p690_p10 = scmp.lt.s32.totalorder %s943_s7, %s1068_s0  ;;  %p691_p2 = scmp.lt.s32.totalorder %s689_s2, %s684_s30 }
  0x2f   : > { %p687_p9 = pnand %p686_p7, %p685_p5 }
  0x30   : > { %p692_p13 = por %p691_p2, %p690_p10 }
  0x31   : > { %p688_p12 = pneg %p687_p9 }
  0x33   : > { %p693_p0 = pnand %p692_p13, %p688_p12 }
  0x35   : > { %696 = shalt.err (!%p693_p0)
}
  0x36   : > { %s697_s19 = scalar_lea.vmem %s239_s11, 128  ;;  %s817_s20 = smov [#allocation2]  }
  0x37   : > { %p698_p1 = scmp.ne.s32.totalorder %s239_s11, %s697_s19  ;;  %s702_s13 = sshll.u32 %s817_s20, 4  ;;  %s703_s13 = int_to_ptr.vmem [resolvable:$false] %s702_s13 }
  0x38   : > { %s704_s14 = scalar_lea.vmem %s703_s13, 256  ;;  %p705_p9 = scmp.lt.s32.totalorder %s239_s11, %s703_s13 }
  0x39   : > { %p700_p6 = pnand %p698_p1, %p686_p7  ;;  %p706_p3 = scmp.lt.s32.totalorder %s704_s14, %s697_s19 }
  0x3b   : > { %p701_p5 = pneg %p700_p6  ;;  %p707_p4 = por %p706_p3, %p705_p9 }
  0x3d   : > { %p708_p8 = pnand %p707_p4, %p701_p5 }
  0x3f   : > { %711 = shalt.err (!%p708_p8)
}
  0x40   : > { %607 = dma.hbm_to_vmem [thread:$0]  (!%p946_p11), %s943_s7, 128, %s239_s11, %s228_s16  }
  0x41   : > { %s245_s2 = sand.u32 1, %s812_s24   ;;  %s249_s23 = scalar_lea.vmem [#allocation5], %s938_s26 }
  0x42   : > { %s256_s17 = sshll.u32 %s249_s23, 4  ;;  %s246_s30 = scalar_lea.sflag [#allocation6], %s245_s2  ;;  %s257_s17 = int_to_ptr.vmem [resolvable:$true] %s256_s17 }
  0x43   : > { %s712_s8 = scalar_lea.hbm %s953_s15, 128  ;;  %s717_s20 = scalar_lea.hbm %s1069_s1, 256 }
  0x44   : > { %p713_p1 = scmp.ne.s32.totalorder %s953_s15, %s712_s8  ;;  %p718_p8 = scmp.lt.s32.totalorder %s953_s15, %s1069_s1 }
  0x45   : > { %p719_p3 = scmp.lt.s32.totalorder %s717_s20, %s712_s8 }
  0x46   : > { %p715_p4 = pnand %p713_p1, %p686_p7 }
  0x47   : > { %p720_p12 = por %p719_p3, %p718_p8 }
  0x48   : > { %p716_p6 = pneg %p715_p4 }
  0x4a   : > { %p721_p10 = pnand %p720_p12, %p716_p6 }
  0x4c   : > { %724 = shalt.err (!%p721_p10)
}
  0x4d   : > { %s725_s26 = scalar_lea.vmem %s257_s17, 128  ;;  %s818_s7 = smov [#allocation5]  }
  0x4e   : > { %p726_p2 = scmp.ne.s32.totalorder %s257_s17, %s725_s26  ;;  %s730_s11 = sshll.u32 %s818_s7, 4  ;;  %s731_s11 = int_to_ptr.vmem [resolvable:$false] %s730_s11 }
  0x4f   : > { %s732_s16 = scalar_lea.vmem %s731_s11, 256  ;;  %p733_p5 = scmp.lt.s32.totalorder %s257_s17, %s731_s11 }
  0x50   : > { %p728_p13 = pnand %p726_p2, %p686_p7  ;;  %p734_p9 = scmp.lt.s32.totalorder %s732_s16, %s725_s26 }
  0x52   : > { %p729_p0 = pneg %p728_p13  ;;  %p735_p1 = por %p734_p9, %p733_p5 }
  0x54   : > { %p736_p4 = pnand %p735_p1, %p729_p0 }
  0x56   : > { %739 = shalt.err (!%p736_p4)
}
  0x57   : > { %610 = dma.hbm_to_vmem [thread:$0]  (!%p946_p11), %s953_s15, 128, %s257_s17, %s246_s30  }
  0x58   : > { %p1091_p6 = scmp.ne.s32.totalorder %s1084_s29, 0 }
  0x59   : > { %s998_s2 = sand.u32 (!%p1091_p6), 1, %s804_s22   ;;  %p1092_p7 = scmp.ne.s32.totalorder (!%p1091_p6), %s1082_s27, 0 }
  0x5a   : > { %265 = sbr.rel (%p1091_p6) target bundleno = 629 (0x275), region = 44  ;;  %s1001_s23 = sshll.u32 (!%p1091_p6), %s998_s2, 3 }
  0x5b   : > { %s268_s8 = scalar_lea.sflag (!%p1091_p6), [#allocation3], %s998_s2  ;;  %s271_s10 = scalar_lea.vmem (!%p1091_p6), [#allocation2], %s1001_s23 }
  0x5f   : > { %783 = dma.done.wait (%p1092_p7), %s268_s8, 128  }
  0x60   : > { %785 = vsyncadd (%p1092_p7), %s268_s8, 4294967168  ;;  %s276_s29 = sand.u32 1, %s878_s25   ;;  %s280_s15 = scalar_lea.vmem [#allocation5], %s1001_s23 }
  0x61   : > { %s277_s12 = scalar_lea.sflag [#allocation6], %s276_s29 }
  0x62   : > { %787 = dma.done.wait (%p1092_p7), %s277_s12, 128  }
  0x63   : > { %789 = vsyncadd (%p1092_p7), %s277_s12, 4294967168  ;;  %p1093_p11 = scmp.eq.s32.totalorder %s878_s25, 0 }
  0x65   : > { %791 = dma.done.wait (%p1093_p11), [#allocation6], 512   ;;  %p1094_p8 = pmov %p1093_p11 }
  0x66   : > { %v819_v0 = vmov 0.0   ;;  %vm820_vm0 = vmmov 0   ;;  %v322_v1 = vld [vmem:[#allocation7 + $0x18] sm:$0xff]  ;;  %v321_v2 = vld [vmem:[#allocation7 + $0x10] sm:$0xff]  ;;  %v320_v3 = vld [vmem:[#allocation7 + $0x8] sm:$0xff]  ;;  %vm330_vm1 = vcmask 261120  }
  0x67   : > { %793 = vsyncadd (%p1094_p8), [#allocation6], 4294966784  ;;  %579 = vmatprep.subr.mxu0 %v819_v0  ;;  %587 = vmatprep.mubr.msk.f32.mxu0 %vm820_vm0, %v819_v0  ;;  %v319_v4 = vld [vmem:[#allocation7] sm:$0xff]  ;;  %v404_v8 = vld [vmem:[%s280_s15] sm:$0xff]  ;;  %s571_s14 = sshll.u32 %s878_s25, 7  ;;  %s317_s26 = scalar_lea.vmem [#allocation8], %s1001_s23 }
  0x68   : > { %580 = vmatpush3.msra.mxu0 %v322_v1  ;;  %v318_v5 = vld [vmem:[%s271_s10] sm:$0xff]  ;;  %s451_s7 = sshll.u32 %s317_s26, 4  ;;  %s449_s8 = scalar_lea.hbm %s1074_s6, %s571_s14  ;;  %s452_s7 = int_to_ptr.vmem [resolvable:$true] %s451_s7 }
  0x69   : > { %581 = vmatprep.subr.mxu0 %v819_v0  ;;  %v566_v6 = vld [vmem:[%s1071_s3] ss:$0 sm:$0xff]  ;;  %s438_s10 = scalar_lea.sflag [#allocation4], %s998_s2  ;;  %s740_s29 = scalar_lea.vmem %s452_s7, 128 }
  0x6a   : > { %582 = vmatpush3.msra.mxu0 %v321_v2  ;;  %v568_v22 = vld [vmem:[%s1072_s4] ss:$0 sm:$0xff]  ;;  %p741_p3 = scmp.ne.s32.totalorder %s452_s7, %s740_s29  ;;  %p1095_p12 = scmp.ne.s32.totalorder %s1089_s18, 0 }
  0x6b   : > { %583 = vmatprep.subr.mxu0 %v819_v0  ;;  %v569_v24 = vld [vmem:[%s1073_s5] ss:$0 sm:$0xff]  ;;  %s821_s12 = smov [#allocation8]  }
  0x6c   : > { %584 = vmatpush3.msra.mxu0 %v320_v3  ;;  %p742_p10 = pnand %p741_p3, %p1095_p12  ;;  %s744_s15 = sshll.u32 %s821_s12, 4  ;;  %s745_s15 = int_to_ptr.vmem [resolvable:$false] %s744_s15 }
  0x6d   : > { %585 = vmatprep.subr.mxu0 %v819_v0  ;;  %s746_s25 = scalar_lea.vmem %s745_s15, 256  ;;  %p747_p13 = scmp.lt.s32.totalorder %s452_s7, %s745_s15 }
  0x6e   : > { %586 = vmatpush3.msra.mxu0 %v319_v4  ;;  %p743_p2 = pneg %p742_p10  ;;  %p748_p0 = scmp.lt.s32.totalorder %s746_s25, %s740_s29 }
  0x6f   : > { %588 = vmatmul.mubr.msk.f32.vlgmr.msra.gmra.mxu0 %vm330_vm1, %v318_v5 }
  0x70   : > { %p749_p5 = por %p748_p0, %p747_p13 }
  0x72   : > { %p750_p9 = pnand %p749_p5, %p743_p2 }
 0x12f   : > { %v400_v7 = vpop.f32.mrf.mxu0 }
 0x130   : > { %v401_v9 = vadd.f32 %v566_v6, %v400_v7 }
 0x131   : > { %v589_v10 = vpop.f32.mrf.mxu0 }
 0x132   : > { %v405_v11 = vadd.f32 %v404_v8, %v401_v9 }
 0x134   : > { %v406_v12 = vsel %vm330_vm1, %v405_v11, 0.0 }
 0x135   : > { %407 = vadd.xlane.f32.xlu0 %v406_v12 }
 0x1be   : > { %v408_v13 = vpop.xlane.xlu0 %407 }
 0x1bf   : > { %v410_v14 = vmul.f32 0.03125, %v408_v13 }
 0x1c1   : > { %v411_v15 = vsub.f32 %v405_v11, %v410_v14 }
 0x1c3   : > { %v412_v16 = vmul.f32 %v411_v15, %v411_v15 }
 0x1c5   : > { %v413_v17 = vsel %vm330_vm1, %v412_v16, 0.0 }
 0x1c6   : > { %414 = vadd.xlane.f32.xlu0 %v413_v17 }
 0x24f   : > { %v415_v18 = vpop.xlane.xlu0 %414 }
 0x250   : > { %v416_v19 = vmul.f32 0.03125, %v415_v18 }
 0x252   : > { %v417_v20 = vadd.f32 1e-12, %v416_v19 }
 0x254   : > { %656 = vrsqrt.f32 %v417_v20 }
 0x261   : > { %v657_v21 = vpop.eup %656 }
 0x262   : > { %v419_v23 = vmul.f32 %v657_v21, %v411_v15 }
 0x264   : > { %v427_v25 = vmul.f32 %v568_v22, %v419_v23 }
 0x266   : > { %v435_v26 = vadd.f32 %v569_v24, %v427_v25 }
 0x268   : > { %436 = vst.msk [vmem:[%s317_s26] sm:$0xff] %vm330_vm1, %v435_v26 }
 0x269   : > { %753 = shalt.err (!%p750_p9)
}
 0x26a   : > { %s754_s23 = scalar_lea.hbm %s449_s8, 128  ;;  %s758_s17 = scalar_lea.hbm %s1074_s6, 256 }
 0x26b   : > { %p755_p1 = scmp.ne.s32.totalorder %s449_s8, %s754_s23  ;;  %p759_p7 = scmp.lt.s32.totalorder %s449_s8, %s1074_s6 }
 0x26c   : > { %p760_p11 = scmp.lt.s32.totalorder %s758_s17, %s754_s23 }
 0x26d   : > { %p756_p4 = pnand %p755_p1, %p1095_p12 }
 0x26e   : > { %p761_p8 = por %p760_p11, %p759_p7 }
 0x26f   : > { %p757_p6 = pneg %p756_p4 }
 0x271   : > { %p762_p3 = pnand %p761_p8, %p757_p6 }
 0x273   : > { %765 = shalt.err (!%p762_p3)
}
 0x274   : > { %598 = dma.vmem_to_hbm [thread:$0]  (%p1095_p12), %s452_s7, 128, %s449_s8, %s438_s10  }
 0x275 PF: > { %s463_s20 = sand.u32 1, %s800_s21   ;;  %p1096_p10 = scmp.ne.s32.totalorder %s1083_s28, 0 }
 0x276   : > { %p1097_p2 = scmp.ge.s32.totalorder %s812_s24, 2  ;;  %s464_s13 = scalar_lea.sflag [#allocation4], %s463_s20 }
 0x278   : > { %p612_p13 = pnand %p1097_p2, %p1096_p10 }
 0x27a   : > { %p613_p0 = pneg %p612_p13 }
 0x27c   : > { %795 = dma.done.wait (%p613_p0), %s464_s13, 128  }
 0x27d   : > { %797 = vsyncadd (%p613_p0), %s464_s13, 4294967168  ;;  %s1098_s14 = sld [smem:[#allocation13_spill]]  ;;  %p22_p5 = scmp.ge.s32.totalorder %s911_s9, 4  }
 0x27e   : > { %s1099_s23 = sld [smem:[#allocation14_spill]]  ;;  %s1100_s21 = smov %s804_s22 }
 0x27f   : > { %s1102_s24 = smov %s911_s9  ;;  %24 = sbr.rel (!%p22_p5) target bundleno = 9 (0x9), region = 106 }
 0x283   : > { %s1101_s22 = smov %s1098_s14 }
 0x284   :  { %469 = vsyncpa [#allocation3], 1 }
 0x285   :  { %471 = vsyncpa [#allocation3 + $0x1], 1 }
 0x286   :  { %472 = vsyncpa [#allocation6], 1 }
 0x287   :  { %474 = vsyncpa [#allocation6 + $0x1], 1 }
 0x288   :  { %475 = vsyncpa [#allocation4], 1 }
 0x289   :  { %477 = vsyncpa [#allocation4 + $0x1], 1 }

</bundles_post_ra>
